<compile_context>
chip_gen: v7x
topology: tpu7x:2x2x1
jax: 0.10.0
libtpu: 0.0.40
codegen_flags: <defaults>
</compile_context>

<pallas_src>
import jax
import jax.numpy as jnp
import numpy as np
from jax.experimental import pallas as pl
from jax.experimental.pallas import tpu as pltpu


def _round_up(v: int, m: int) -> int:
    return ((v + m - 1) // m) * m


def _rfl_kernel(xn_ref, w_ref, b_ref, o_ref):
    # xn_ref: (TB, IN_PAD) bf16  (rows pre-normalized in the wrapper)
    # w_ref : (IN_PAD, TN) bf16
    # b_ref : (1, TN)      f32
    # o_ref : (TB, TN)     out_dtype
    y = jnp.dot(xn_ref[...], w_ref[...], preferred_element_type=jnp.float32)
    y = y + b_ref[...]
    o_ref[...] = jnp.maximum(y, 0.0).astype(o_ref.dtype)   # activation_fn == ReLU


def _vmem_capacity_bytes() -> int:
    try:
        info = pltpu.get_tpu_info()
        cap = getattr(info, "vmem_capacity_bytes", None)
        if cap:
            return int(cap)
    except Exception:
        pass
    return 64 * 2 ** 20   # conservative fallback: v7x per-TC VMEM


def _vmem_need(bb: int, bn: int, in_pad: int, out_bytes: int) -> int:
    return (2 * bb * in_pad * 2          # xn tile (bf16), double-buffered
            + 2 * in_pad * bn * 2        # weight tile (bf16), double-buffered
            + 2 * 8 * bn * 4             # bias tile (f32, sublane-padded), double-buffered
            + 2 * bb * bn * out_bytes)   # output tile, double-buffered


def _choose_tiles(batch, in_pad, out_pad, out_bytes, block_b_max, block_n_max, vmem_budget):
    """Pick (block_b, B_pad, block_n): minimal batch padding, lane-dense out tiles."""
    block_b_max = max(8, block_b_max)
    n_i = max(1, -(-batch // block_b_max))
    while True:
        # block_b so that B_pad - batch < block_b (no wasted grid rows).
        block_b = _round_up(-(-batch // n_i), 8)
        # largest 128-multiple divisor of out_pad that fits the VMEM budget.
        cand = min(out_pad, _round_up(block_n_max, 128))
        while cand >= 128:
            if out_pad % cand == 0 and _vmem_need(block_b, cand, in_pad, out_bytes) <= vmem_budget:
                return block_b, n_i * block_b, cand
            cand -= 128
        if block_b <= 8:
            return block_b, n_i * block_b, 128   # smallest legal tile, last resort
        n_i += 1


def recurrent_forward_layer(x, w_t, b, *, block_b_max=512, block_n_max=1024,
                            out_dtype=jnp.float32):
    """Forward pass of RecurrentForwardLayer (inference path).

    x   : (B, input_size)              float32
    w_t : (input_size, output_size)    float32 (transpose of torch Linear weight)
    b   : (output_size,)               float32
    returns (B, output_size)           out_dtype (f32 by default)
    """
    B, in_size = x.shape
    in_size_w, out_size = w_t.shape
    assert in_size_w == in_size and b.shape == (out_size,)

    # ---- wrapper-side prep (hoisted out of the grid, fused by XLA) ----------
    # Exact f32 normalization with the same epsilon placement as the torch
    # module, then a single cast to bf16 for the MXU.  Doing it here removes the
    # cross-grid-step scratch dependency (both axes become "parallel") and
    # halves x-side DMA.
    xf = x.astype(jnp.float32)
    mean_sq = jnp.mean(xf * xf, axis=1, keepdims=True)
    xn = (xf / (1e-9 + jnp.sqrt(mean_sq))).astype(jnp.bfloat16)

    in_pad = _round_up(in_size, 128)      # lane-aligned K (zero cols/rows are inert)
    out_pad = _round_up(out_size, 128)    # lane-dense, unmasked stores

    out_bytes = int(np.dtype(out_dtype).itemsize)
    vmem_budget = int(0.85 * _vmem_capacity_bytes())   # headroom for compiler scratch

    block_b, B_pad, block_n = _choose_tiles(
        B, in_pad, out_pad, out_bytes, block_b_max, block_n_max, vmem_budget)

    xn = jnp.pad(xn, ((0, B_pad - B), (0, in_pad - in_size)))
    w_bf16 = jnp.pad(w_t.astype(jnp.bfloat16),
                     ((0, in_pad - in_size), (0, out_pad - out_size)))
    b_p = jnp.pad(b.astype(jnp.float32), (0, out_pad - out_size)).reshape(1, out_pad)

    n_i = B_pad // block_b
    n_j = out_pad // block_n

    # ---- grid order: keep the more expensive-to-re-stream operand resident ---
    # batch-outer: x streamed once, weight re-streamed n_i times
    # out-outer  : weight streamed once, x re-streamed n_j times
    x_bytes = B_pad * in_pad * 2
    w_bytes = in_pad * out_pad * 2
    batch_outer = (x_bytes + n_i * w_bytes) <= (n_j * x_bytes + w_bytes)

    if batch_outer:
        grid = (n_i, n_j)
        x_map = lambda a, c: (a, 0)
        w_map = lambda a, c: (0, c)      # also used for bias
        o_map = lambda a, c: (a, c)
        streamed_bytes = x_bytes + n_i * w_bytes
    else:
        grid = (n_j, n_i)
        x_map = lambda a, c: (c, 0)
        w_map = lambda a, c: (0, a)      # also used for bias
        o_map = lambda a, c: (c, a)
        streamed_bytes = n_j * x_bytes + w_bytes

    vmem_need = _vmem_need(block_b, block_n, in_pad, out_bytes)
    vmem_limit = int(min(vmem_budget, max(4 * 2 ** 20, vmem_need + (1 << 20))))

    cost = pl.CostEstimate(
        flops=2 * B_pad * in_pad * out_pad,
        transcendentals=0,
        bytes_accessed=streamed_bytes + b_p.size * 4 + B_pad * out_pad * out_bytes,
    )

    out = pl.pallas_call(
        _rfl_kernel,
        out_shape=jax.ShapeDtypeStruct((B_pad, out_pad), out_dtype),
        grid_spec=pltpu.PrefetchScalarGridSpec(
            num_scalar_prefetch=0,
            grid=grid,
            in_specs=[
                pl.BlockSpec((block_b, in_pad), x_map),
                pl.BlockSpec((in_pad, block_n), w_map),
                pl.BlockSpec((1, block_n), w_map),
            ],
            out_specs=pl.BlockSpec((block_b, block_n), o_map),
        ),
        compiler_params=pltpu.CompilerParams(
            # No cross-step state: both grid axes are independent, so megacore /
            # v7x dual-TC sharding works even when one axis has a single tile.
            dimension_semantics=("parallel", "parallel"),
            vmem_limit_bytes=vmem_limit,
        ),
        cost_estimate=cost,
    )(xn, w_bf16, b_p)

    return out[:B, :out_size]


def _reference(x, w_t, b):
    # Pure-JAX f32 reference matching the torch module's forward (freeze=True).
    mean_sq = jnp.mean(x * x, axis=1, keepdims=True)
    xn = x / (1e-9 + jnp.sqrt(mean_sq))
    return jnp.maximum(xn @ w_t + b[None, :], 0.0)


if __name__ == "__main__":
    key = jax.random.PRNGKey(0)
    k_x, k_w = jax.random.split(key)

    batch = 6            # exercises batch padding (-> 8)
    input_size = 64      # exercises K padding (-> 128)
    output_size = 48     # exercises lane padding (-> 128)

    # deterministic xavier-normal weight init, zero bias (matches __init__)
    std = (2.0 / (input_size + output_size)) ** 0.5
    w_torch_layout = std * jax.random.normal(
        k_w, (output_size, input_size), dtype=jnp.float32)
    w_t = w_torch_layout.T                      # (input_size, output_size)
    b = jnp.zeros((output_size,), dtype=jnp.float32)

    x = jax.random.normal(k_x, (batch, input_size), dtype=jnp.float32)

    out = recurrent_forward_layer(x, w_t, b)
    out = jax.block_until_ready(out)

    ref = _reference(x, w_t, b)
    assert out.shape == (batch, output_size)
    # bf16 MXU operands with f32 accumulation (normalization is exact f32).
    assert jnp.allclose(out, ref, atol=2e-2, rtol=2e-2), \
        float(jnp.max(jnp.abs(out - ref)))

    print("KERNEL_OK")
</pallas_src>

<mosaic_0001>
module attributes {stable_mosaic.version = 11 : i64} {
  func.func @_rfl_kernel(%arg0: i32, %arg1: i32, %arg2: memref<8x128xbf16, #tpu.memory_space<vmem>>, %arg3: memref<128x128xbf16, #tpu.memory_space<vmem>>, %arg4: memref<1x128xf32, #tpu.memory_space<vmem>>, %arg5: memref<8x128xf32, #tpu.memory_space<vmem>>) attributes {dimension_semantics = [#tpu.dimension_semantics<parallel>, #tpu.dimension_semantics<parallel>], iteration_bounds = array<i64: 1, 1>, scalar_prefetch = 0 : i64, scratch_operands = 0 : i64, tpu.core_type = #tpu.core_type<tc>, window_params = [{transform_indices = @transform_0, window_bounds = array<i64: 8, 128>}, {transform_indices = @transform_1, window_bounds = array<i64: 128, 128>}, {transform_indices = @transform_2, window_bounds = array<i64: 1, 128>}, {transform_indices = @transform_3, window_bounds = array<i64: 8, 128>}]} {
    %c0 = arith.constant 0 : index
    %c0_0 = arith.constant 0 : index
    %0 = vector.load %arg2[%c0, %c0_0] : memref<8x128xbf16, #tpu.memory_space<vmem>>, vector<8x128xbf16>
    %c0_1 = arith.constant 0 : index
    %c0_2 = arith.constant 0 : index
    %1 = vector.load %arg3[%c0_1, %c0_2] : memref<128x128xbf16, #tpu.memory_space<vmem>>, vector<128x128xbf16>
    %cst = arith.constant dense<0.000000e+00> : vector<8x128xf32>
    %2 = tpu.matmul %0, %1, %cst {dimension_numbers = #tpu.dot_dimension_numbers<[1], [0], [0], [1], [0, 0, 1, 1], [], []>} : vector<8x128xbf16>, vector<128x128xbf16>, vector<8x128xf32> -> vector<8x128xf32>
    %c0_3 = arith.constant 0 : index
    %c0_4 = arith.constant 0 : index
    %3 = vector.load %arg4[%c0_3, %c0_4] : memref<1x128xf32, #tpu.memory_space<vmem>>, vector<1x128xf32>
    %4 = vector.broadcast %3 : vector<1x128xf32> to vector<8x128xf32>
    %5 = arith.addf %2, %4 : vector<8x128xf32>
    %cst_5 = arith.constant 0.000000e+00 : f32
    %6 = vector.broadcast %cst_5 : f32 to vector<8x128xf32>
    %7 = arith.maximumf %5, %6 : vector<8x128xf32>
    %c0_6 = arith.constant 0 : index
    %c0_7 = arith.constant 0 : index
    %8 = vector.load %arg5[%c0_6, %c0_7] : memref<8x128xf32, #tpu.memory_space<vmem>>, vector<8x128xf32>
    tpu.vector_store %arg5[%c0_6, %c0_7], %7 {strides = array<i32>} : memref<8x128xf32, #tpu.memory_space<vmem>>, vector<8x128xf32>,
    return
  }
  func.func @transform_0(%arg0: i32, %arg1: i32) -> (i32, i32) {
    %c0_i32 = arith.constant 0 : i32
    %c0_i32_0 = arith.constant 0 : i32
    return %arg0, %c0_i32 : i32, i32
  }
  func.func @transform_1(%arg0: i32, %arg1: i32) -> (i32, i32) {
    %c0_i32 = arith.constant 0 : i32
    %c0_i32_0 = arith.constant 0 : i32
    return %c0_i32, %arg1 : i32, i32
  }
  func.func @transform_2(%arg0: i32, %arg1: i32) -> (i32, i32) {
    %c0_i32 = arith.constant 0 : i32
    %c0_i32_0 = arith.constant 0 : i32
    return %c0_i32, %arg1 : i32, i32
  }
  func.func @transform_3(%arg0: i32, %arg1: i32) -> (i32, i32) {
    %c0_i32 = arith.constant 0 : i32
    return %arg0, %arg1 : i32, i32
  }
}

</mosaic_0001>

<bundles_post_ra>
// kernel: tpu_custom_call.1
= control target key start
LH: loop header
LB: loop body
LE: loop exit
PB: predicated region body
PF: predicated region fallthrough
CT: control target
= control target key end

     0   :  { %8 = vsyncpa [#allocation3], 0  ;;  %s370_s0 = inlined_call_operand.hbm [shape: bf16[8,128], index: 0, kind: input, shape index: {}]   ;;  %s371_s1 = inlined_call_operand.hbm [shape: bf16[128,128], index: 1, kind: input, shape index: {}]   ;;  %s372_s2 = inlined_call_operand.vmem [shape: f32[1,128], index: 2, kind: input, shape index: {}]   ;;  %s373_s3 = inlined_call_operand.hbm [shape: f32[8,128], index: 3, kind: output, shape index: {}]  }
   0x1   :  { %9 = vsyncpa [#allocation6], 0 }
   0x2   :  { %10 = vsyncpa [#allocation4], 0  ;;  %s297_s12 = smov [#allocation2]   ;;  %s298_s14 = smov [#allocation5]  }
   0x3   :  { %s17_s13 = sshll.u32 %s297_s12, 4  ;;  %s26_s15 = sshll.u32 %s298_s14, 4  ;;  %s18_s13 = int_to_ptr.vmem [resolvable:$true] %s17_s13  ;;  %s324_s15 = int_to_ptr.vmem [resolvable:$true] %s26_s15 }
   0x4   :  { %s225_s18 = scalar_lea.hbm %s370_s0, 64 }
   0x5   :  { %p226_p0 = scmp.ne.s32.totalorder %s370_s0, %s225_s18  ;;  %p229_p1 = scmp.lt.u32.totalorder %s225_s18, %s370_s0 }
   0x7   :  { %p231_p2 = pnand %p229_p1, %p226_p0 }
   0x9   :  { %234 = shalt.err (!%p231_p2)
}
   0xa   :  { %s235_s23 = scalar_lea.vmem %s18_s13, 64  ;;  %p240_p4 = scmp.lt.s32.totalorder %s18_s13, %s18_s13 }
   0xb   :  { %p236_p3 = scmp.ne.s32.totalorder %s18_s13, %s235_s23  ;;  %p241_p5 = scmp.lt.s32.totalorder %s235_s23, %s235_s23 }
   0xd   :  { %p242_p6 = por %p241_p5, %p240_p4 }
   0xf   :  { %p243_p7 = pnand %p242_p6, %p236_p3 }
  0x11   :  { %246 = shalt.err (!%p243_p7)
}
  0x12   :  { %20 = dma.hbm_to_vmem [thread:$0]  %s370_s0, 64, %s18_s13, [#allocation3]  }
  0x13   :  { %s247_s28 = scalar_lea.hbm %s371_s1, 1024 }
  0x14   :  { %p248_p8 = scmp.ne.s32.totalorder %s371_s1, %s247_s28  ;;  %p251_p9 = scmp.lt.u32.totalorder %s247_s28, %s371_s1 }
  0x16   :  { %p253_p10 = pnand %p251_p9, %p248_p8 }
  0x18   :  { %256 = shalt.err (!%p253_p10)
}
  0x19   :  { %s257_s6 = scalar_lea.vmem %s324_s15, 1024  ;;  %p262_p12 = scmp.lt.s32.totalorder %s324_s15, %s324_s15 }
  0x1a   :  { %p258_p11 = scmp.ne.s32.totalorder %s324_s15, %s257_s6  ;;  %p263_p13 = scmp.lt.s32.totalorder %s257_s6, %s257_s6 }
  0x1c   :  { %p264_p0 = por %p263_p13, %p262_p12 }
  0x1e   :  { %p265_p1 = pnand %p264_p0, %p258_p11 }
  0x20   :  { %268 = shalt.err (!%p265_p1)
}
  0x21   :  { %s299_s0 = smov 64   ;;  %s300_s7 = smov 4  }
  0x22   :  { %32 = dma.hbm_to_vmem [thread:$0]  %s371_s1, 1024, %s324_s15, [#allocation6], %s299_s0, %s299_s0, %s300_s7  }
  0x23   :  { %291 = dma.done.wait [#allocation3], 64  }
  0x24   :  { %292 = vsyncadd [#allocation3], 4294967232 }
  0x25   :  { %293 = dma.done.wait [#allocation6], 1024  }
  0x26   :  { %294 = vsyncadd [#allocation6], 4294966272  ;;  %v301_v0 = vmov 0.0   ;;  %vm302_vm0 = vmmov 0   ;;  %v217_v1 = vld [vmem:[#allocation5] sm:$0xff]   ;;  %v218_v2 = vld [vmem:[#allocation5 + $0x8] sm:$0xff]  }
  0x27   :  { %190 = vmatprep.subr.bf16.mxu0 %v301_v0  ;;  %206 = vmatprep.mubr.msk.bf16.mxu0 %vm302_vm0, %v301_v0  ;;  %v219_v3 = vld [vmem:[#allocation5 + $0x10] sm:$0xff]   ;;  %v220_v4 = vld [vmem:[#allocation5 + $0x18] sm:$0xff]   ;;  %v221_v5 = vld [vmem:[#allocation5 + $0x20] sm:$0xff]   ;;  %s303_s11 = smov [#allocation7]  }
  0x28   :  { %191 = vmatpush3.bf16.msra.mxu0 %v217_v1  ;;  %v222_v6 = vld [vmem:[#allocation5 + $0x28] sm:$0xff]   ;;  %v223_v7 = vld [vmem:[#allocation5 + $0x30] sm:$0xff]   ;;  %v224_v8 = vld [vmem:[#allocation5 + $0x38] sm:$0xff]   ;;  %s162_s12 = sshll.u32 %s303_s11, 4  ;;  %s163_s12 = int_to_ptr.vmem [resolvable:$true] %s162_s12 }
  0x29   :  { %192 = vmatprep.subr.bf16.mxu0 %v301_v0  ;;  %v42_v9 = vld [vmem:[#allocation2] sm:$0xf]  ;;  %s269_s13 = scalar_lea.vmem %s163_s12, 128  ;;  %p274_p3 = scmp.lt.s32.totalorder %s163_s12, %s163_s12 }
  0x2a   :  { %v172_v10 = vld [vmem:[%s372_s2] ss:$0 sm:$0xff]  ;;  %p270_p2 = scmp.ne.s32.totalorder %s163_s12, %s269_s13  ;;  %p275_p4 = scmp.lt.s32.totalorder %s269_s13, %s269_s13 }
  0x2c   :  { %193 = vmatpush3.bf16.msra.mxu0 %v218_v2  ;;  %p276_p5 = por %p275_p4, %p274_p3 }
  0x2d   :  { %194 = vmatprep.subr.bf16.mxu0 %v301_v0 }
  0x2e   :  { %p277_p6 = pnand %p276_p5, %p270_p2 }
  0x30   :  { %195 = vmatpush3.bf16.msra.mxu0 %v219_v3 }
  0x31   :  { %196 = vmatprep.subr.bf16.mxu0 %v301_v0 }
  0x34   :  { %197 = vmatpush3.bf16.msra.mxu0 %v220_v4 }
  0x35   :  { %198 = vmatprep.subr.bf16.mxu0 %v301_v0 }
  0x38   :  { %199 = vmatpush3.bf16.msra.mxu0 %v221_v5 }
  0x39   :  { %200 = vmatprep.subr.bf16.mxu0 %v301_v0 }
  0x3c   :  { %201 = vmatpush3.bf16.msra.mxu0 %v222_v6 }
  0x3d   :  { %202 = vmatprep.subr.bf16.mxu0 %v301_v0 }
  0x40   :  { %203 = vmatpush3.bf16.msra.mxu0 %v223_v7 }
  0x41   :  { %204 = vmatprep.subr.bf16.mxu0 %v301_v0 }
  0x44   :  { %205 = vmatpush3.bf16.msra.mxu0 %v224_v8 }
  0x47   :  { %207 = vmatmul.mubr.bf16.vlgmr.msra.gmra.mrb[0].mxu0 %v42_v9 }
 0x11a   :  { %v148_v11 = vpop.f32.mrb[0].mxu0 }
 0x11b   :  { %v149_v12 = vadd.f32 %v172_v10, %v148_v11  ;;  %v208_v13 = vpop.f32.mrb[1].mxu0 }
 0x11c   :  { %v151_v14 = vpop.f32.mrb[2].mxu0 }
 0x11d   :  { %v154_v15 = vmax.f32 %v149_v12, 0.0  ;;  %v209_v16 = vpop.f32.mrb[3].mxu0 }
 0x11f   :  { %155 = vst [vmem:[#allocation7] sm:$0xff] %v154_v15 }
 0x120   :  { %280 = shalt.err (!%p277_p6)
}
 0x121   :  { %s281_s2 = scalar_lea.hbm %s373_s3, 128 }
 0x122   :  { %p282_p7 = scmp.ne.s32.totalorder %s373_s3, %s281_s2  ;;  %p285_p8 = scmp.lt.u32.totalorder %s281_s2, %s373_s3 }
 0x124   :  { %p287_p9 = pnand %p285_p8, %p282_p7 }
 0x126   :  { %290 = shalt.err (!%p287_p9)
}
 0x127   :  { %165 = dma.vmem_to_hbm [thread:$0]  %s163_s12, 128, %s373_s3, [#allocation4]  }
 0x128   :  { %295 = dma.done.wait [#allocation4], 128  }
 0x129   :  { %296 = vsyncadd [#allocation4], 4294967168 }
 0x12a   :  { %169 = vsyncpa [#allocation3], 1 }
 0x12b   :  { %170 = vsyncpa [#allocation6], 1 }
 0x12c   :  { %171 = vsyncpa [#allocation4], 1 }

</bundles_post_ra>
